<compile_context>
chip_gen: v7x
topology: tpu7x:2x2x1
jax: 0.10.0
libtpu: 0.0.40
codegen_flags: <defaults>
</compile_context>

<pallas_src>
import jax
import jax.numpy as jnp
from jax.experimental import pallas as pl
from jax.experimental.pallas import tpu as pltpu


def _copy_kernel(x_ref, o_ref):
    # Pure tile copy; the flatten itself already happened (for free) in the
    # wrapper's metadata-only reshape.
    o_ref[...] = x_ref[...]


def _round_down(x, m):
    return (x // m) * m


def _chip_block_params():
    """Generation-aware (target block bytes, vmem_limit_bytes, num tensorcores)."""
    kind = ""
    try:
        kind = jax.devices()[0].device_kind.lower()
    except Exception:
        pass

    target_block_bytes = 4 << 20  # default: v6e-class sizing
    vmem_limit_bytes = None
    num_cores = 1

    if "v7" in kind:
        # 3.2 TB/s HBM: larger blocks amortize the ~0.35 us/step overhead.
        # 2 arrays x 2 buffers x 8 MiB = 32 MiB; raise scoped VMEM (64 MiB phys).
        target_block_bytes = 8 << 20
        vmem_limit_bytes = 48 << 20
        num_cores = 2
    elif "v6" in kind:
        target_block_bytes = 4 << 20  # 2x2x4 = 16 MiB < 32 MiB default scoped VMEM
    elif "v5 lite" in kind or "v5lite" in kind or "v5e" in kind:
        target_block_bytes = 2 << 20  # v5e default scoped VMEM is only 16 MiB
    elif "v2" in kind or "v3" in kind:
        target_block_bytes = 1 << 20  # older gens: small scoped VMEM

    # Sanity-cap against reported VMEM capacity when the query is available.
    try:
        vmem_cap = pltpu.get_tpu_info().vmem_capacity_bytes
        target_block_bytes = min(target_block_bytes, max(1 << 20, vmem_cap // 8))
    except Exception:
        pass

    return target_block_bytes, vmem_limit_bytes, num_cores


def _pallas_copy(x2, n, flat, total, itemsize, sublane_align):
    """Lane-dense Pallas copy of the already-flattened (n, flat) view."""
    target_block_bytes, vmem_limit_bytes, num_cores = _chip_block_params()
    lane_cap = 8192  # elements; lane-dense, unmasked vst, moderate lane width

    if total % 128 == 0:
        # --- Contiguous path: re-view the flat buffer as (rows, lane) with
        # lane a multiple of 128 dividing the total element count.  Blocks
        # cover full rows -> each block DMA is one contiguous HBM run.
        g = total // 128
        k = 1
        for cand in range(min(lane_cap // 128, g), 0, -1):
            if g % cand == 0:
                k = cand
                break
        lane = 128 * k
        rows = total // lane

        max_rows = max(1, target_block_bytes // (lane * itemsize))
        if rows > max_rows:
            bm = max(sublane_align, _round_down(max_rows, sublane_align))
        else:
            bm = rows
            # On v7x (2 TensorCores), split large single-block copies so both
            # cores get work; the ragged second block is masked by Pallas.
            if (num_cores > 1 and rows >= 2 * sublane_align
                    and rows * lane * itemsize >= (2 << 20)):
                half = -(-rows // 2)
                cand_bm = ((half + sublane_align - 1) // sublane_align) * sublane_align
                if sublane_align <= cand_bm < rows:
                    bm = cand_bm

        x_view = jnp.reshape(x2, (rows, lane))
        grid = (pl.cdiv(rows, bm),)
        in_specs = [pl.BlockSpec((bm, lane), lambda i: (i, 0))]
        out_specs = pl.BlockSpec((bm, lane), lambda i: (i, 0))
        out_shape = jax.ShapeDtypeStruct((rows, lane), x2.dtype)
        dim_sem = ("parallel",)
    else:
        # --- Fallback (total not a multiple of 128): tile (n, flat) directly.
        # Lane tile is the full dim or a large multiple of 128 -- never a tiny
        # exact divisor; ragged edge blocks are masked by Pallas.
        bn = flat if flat <= lane_cap else lane_cap
        max_rows = max(1, target_block_bytes // max(1, bn * itemsize))
        if n <= max_rows:
            bm = n
        else:
            bm = max(sublane_align, _round_down(max_rows, sublane_align))
        x_view = x2
        grid = (pl.cdiv(n, bm), pl.cdiv(flat, bn))
        in_specs = [pl.BlockSpec((bm, bn), lambda i, j: (i, j))]
        out_specs = pl.BlockSpec((bm, bn), lambda i, j: (i, j))
        out_shape = jax.ShapeDtypeStruct((n, flat), x2.dtype)
        dim_sem = ("parallel", "parallel")

    cost = pl.CostEstimate(
        flops=0,
        transcendentals=0,
        bytes_accessed=2 * total * itemsize,
    )

    cp_kwargs = dict(dimension_semantics=dim_sem)
    if vmem_limit_bytes is not None:
        cp_kwargs["vmem_limit_bytes"] = vmem_limit_bytes

    out = pl.pallas_call(
        _copy_kernel,
        out_shape=out_shape,
        grid_spec=pltpu.PrefetchScalarGridSpec(
            num_scalar_prefetch=0,
            grid=grid,
            in_specs=in_specs,
            out_specs=out_specs,
        ),
        compiler_params=pltpu.CompilerParams(**cp_kwargs),
        cost_estimate=cost,
    )(x_view)

    return jnp.reshape(out, (n, flat))


def flatten(x: jax.Array, *, use_pallas_copy: bool = False) -> jax.Array:
    """Flatten all dims except the leading (batch) dim, like torch x.view(N, -1).

    Default is the metadata-only reshape (fastest standalone path).  Set
    use_pallas_copy=True to materialize the result through the Pallas copy
    kernel (for fusion into larger Pallas pipelines / benchmarking).
    """
    n = x.shape[0]
    flat = 1
    for d in x.shape[1:]:
        flat *= d

    x2 = jnp.reshape(x, (n, flat))  # free, metadata-only for contiguous arrays
    if not use_pallas_copy:
        return x2

    total = n * flat
    if total == 0:
        return x2  # degenerate: empty array, nothing to copy

    itemsize = jnp.dtype(x.dtype).itemsize
    # Native sublane tile: f32 -> 8, bf16 -> 16, int8/fp8 -> 32.
    sublane_align = max(8, 32 // itemsize)
    return _pallas_copy(x2, n, flat, total, itemsize, sublane_align)


if __name__ == "__main__":
    key = jax.random.PRNGKey(0)
    # Small NCHW input consistent with a conv feature map: batch=2, C=4, H=W=16
    x = jax.random.normal(key, (2, 4, 16, 16), dtype=jnp.float32)

    y_fast = flatten(x)                           # standalone fast path
    y_kernel = flatten(x, use_pallas_copy=True)   # Pallas copy path
    jax.block_until_ready(y_kernel)

    y_ref = x.reshape(x.shape[0], -1)
    assert y_fast.shape == (2, 4 * 16 * 16), y_fast.shape
    assert y_kernel.shape == (2, 4 * 16 * 16), y_kernel.shape
    assert jnp.array_equal(y_fast, y_ref), "fast path mismatch vs reference"
    assert jnp.array_equal(y_kernel, y_ref), "kernel path mismatch vs reference"

    # Also exercise the non-128-divisible fallback tiling.
    key2 = jax.random.PRNGKey(0)
    x_odd = jax.random.normal(key2, (3, 5, 7), dtype=jnp.float32)
    y_odd = flatten(x_odd, use_pallas_copy=True)
    jax.block_until_ready(y_odd)
    assert jnp.array_equal(y_odd, x_odd.reshape(3, -1)), "fallback path mismatch"

    print("KERNEL_OK")
</pallas_src>

<mosaic_0001>
module attributes {stable_mosaic.version = 11 : i64} {
  func.func @_copy_kernel(%arg0: i32, %arg1: memref<1x2048xf32, #tpu.memory_space<vmem>>, %arg2: memref<1x2048xf32, #tpu.memory_space<vmem>>) attributes {dimension_semantics = [#tpu.dimension_semantics<parallel>], iteration_bounds = array<i64: 1>, scalar_prefetch = 0 : i64, scratch_operands = 0 : i64, tpu.core_type = #tpu.core_type<tc>, window_params = [{transform_indices = @transform_0, window_bounds = array<i64: 1, 2048>}, {transform_indices = @transform_1, window_bounds = array<i64: 1, 2048>}]} {
    %c0 = arith.constant 0 : index
    %c0_0 = arith.constant 0 : index
    %0 = vector.load %arg1[%c0, %c0_0] : memref<1x2048xf32, #tpu.memory_space<vmem>>, vector<1x2048xf32>
    %c0_1 = arith.constant 0 : index
    %c0_2 = arith.constant 0 : index
    %1 = vector.load %arg2[%c0_1, %c0_2] : memref<1x2048xf32, #tpu.memory_space<vmem>>, vector<1x2048xf32>
    tpu.vector_store %arg2[%c0_1, %c0_2], %0 {strides = array<i32>} : memref<1x2048xf32, #tpu.memory_space<vmem>>, vector<1x2048xf32>,
    return
  }
  func.func @transform_0(%arg0: i32) -> (i32, i32) {
    %c0_i32 = arith.constant 0 : i32
    %c0_i32_0 = arith.constant 0 : i32
    return %arg0, %c0_i32 : i32, i32
  }
  func.func @transform_1(%arg0: i32) -> (i32, i32) {
    %c0_i32 = arith.constant 0 : i32
    %c0_i32_0 = arith.constant 0 : i32
    return %arg0, %c0_i32 : i32, i32
  }
}

</mosaic_0001>

<bundles_post_ra>
// kernel: tpu_custom_call.1
= control target key start
LH: loop header
LB: loop body
LE: loop exit
PB: predicated region body
PF: predicated region fallthrough
CT: control target
= control target key end

     0   :  { %6 = vsyncpa [#allocation3], 0  ;;  %s126_s0 = inlined_call_operand.hbm [shape: f32[1,2048], index: 0, kind: input, shape index: {}]   ;;  %s127_s1 = inlined_call_operand.hbm [shape: f32[1,2048], index: 1, kind: output, shape index: {}]  }
   0x1   :  { %7 = vsyncpa [#allocation4], 0  ;;  %s90_s6 = smov [#allocation2]   ;;  %s42_s10 = scalar_lea.hbm %s126_s0, 256 }
   0x2   :  { %s14_s7 = sshll.u32 %s90_s6, 4  ;;  %p43_p0 = scmp.ne.s32.totalorder %s126_s0, %s42_s10  ;;  %s15_s7 = int_to_ptr.vmem [resolvable:$true] %s14_s7 }
   0x3   :  { %p46_p1 = scmp.lt.u32.totalorder %s42_s10, %s126_s0 }
   0x5   :  { %p48_p2 = pnand %p46_p1, %p43_p0 }
   0x7   :  { %51 = shalt.err (!%p48_p2)
}
   0x8   :  { %s52_s15 = scalar_lea.vmem %s15_s7, 256  ;;  %p57_p4 = scmp.lt.s32.totalorder %s15_s7, %s15_s7 }
   0x9   :  { %p53_p3 = scmp.ne.s32.totalorder %s15_s7, %s52_s15  ;;  %p58_p5 = scmp.lt.s32.totalorder %s52_s15, %s52_s15 }
   0xb   :  { %p59_p6 = por %p58_p5, %p57_p4 }
   0xd   :  { %p60_p7 = pnand %p59_p6, %p53_p3 }
   0xf   :  { %63 = shalt.err (!%p60_p7)
}
  0x10   :  { %17 = dma.hbm_to_vmem [thread:$0]  %s126_s0, 256, %s15_s7, [#allocation3]  }
  0x11   :  { %86 = dma.done.wait [#allocation3], 256  }
  0x12   :  { %87 = vsyncadd [#allocation3], 4294967040  ;;  %s91_s18 = smov [#allocation5]   ;;  %v21_v0 = vld [vmem:[#allocation2] sm:$0xff]  ;;  %v22_v1 = vld [vmem:[#allocation2 + $0x8] sm:$0xff] }
  0x13   :  { %s31_s19 = sshll.u32 %s91_s18, 4  ;;  %23 = vst [vmem:[#allocation5] sm:$0xff] %v21_v0  ;;  %24 = vst [vmem:[#allocation5 + $0x8] sm:$0xff] %v22_v1  ;;  %s32_s19 = int_to_ptr.vmem [resolvable:$true] %s31_s19 }
  0x14   :  { %s64_s20 = scalar_lea.vmem %s32_s19, 256  ;;  %p69_p9 = scmp.lt.s32.totalorder %s32_s19, %s32_s19 }
  0x15   :  { %p65_p8 = scmp.ne.s32.totalorder %s32_s19, %s64_s20  ;;  %p70_p10 = scmp.lt.s32.totalorder %s64_s20, %s64_s20 }
  0x17   :  { %p71_p11 = por %p70_p10, %p69_p9 }
  0x19   :  { %p72_p12 = pnand %p71_p11, %p65_p8 }
  0x1b   :  { %75 = shalt.err (!%p72_p12)
}
  0x1c   :  { %s76_s0 = scalar_lea.hbm %s127_s1, 256 }
  0x1d   :  { %p77_p13 = scmp.ne.s32.totalorder %s127_s1, %s76_s0  ;;  %p80_p0 = scmp.lt.u32.totalorder %s76_s0, %s127_s1 }
  0x1f   :  { %p82_p1 = pnand %p80_p0, %p77_p13 }
  0x21   :  { %85 = shalt.err (!%p82_p1)
}
  0x22   :  { %34 = dma.vmem_to_hbm [thread:$0]  %s32_s19, 256, %s127_s1, [#allocation4]  }
  0x23   :  { %88 = dma.done.wait [#allocation4], 256  }
  0x24   :  { %89 = vsyncadd [#allocation4], 4294967040 }
  0x25   :  { %38 = vsyncpa [#allocation3], 1 }
  0x26   :  { %39 = vsyncpa [#allocation4], 1 }

</bundles_post_ra>
